<compile_context>
chip_gen: v6e
topology: v6e:2x2x1
jax: 0.10.0
libtpu: 0.0.40
codegen_flags: <defaults>
</compile_context>

<pallas_src>
import jax
import jax.numpy as jnp
from jax.experimental import pallas as pl
from jax.experimental.pallas import tpu as pltpu


# ---------------------------------------------------------------------------
# Per-property loss math (vector domain; each returns per-row sums, shape
# (B, 1), scaled so that jnp.sum(rows) == the mean-reduced loss).
# ---------------------------------------------------------------------------

def _bce_with_logits_rows(x, t):
    # F.binary_cross_entropy_with_logits(x, t), mean reduction.
    # Stable form: max(x,0) - x*t + log1p(exp(-|x|)); exp/log1p land on EUP.
    per = jnp.maximum(x, 0.0) - x * t + jnp.log1p(jnp.exp(-jnp.abs(x)))
    return jnp.sum(per, axis=1, keepdims=True) * jnp.float32(1.0 / per.size)


def _nll_rows(logp, tgt_f32):
    # F.nll_loss(logp, tgt), mean reduction. logp: (N, C) log-probs,
    # tgt_f32: (N, 1) class indices carried as exact f32 values.
    # One-hot selection via iota compare + where (no gather, no converts/vmuls
    # per element beyond the select).
    n, c = logp.shape
    cls_ids = jax.lax.broadcasted_iota(jnp.int32, (n, c), 1).astype(jnp.float32)
    picked = jnp.where(cls_ids == tgt_f32, logp, 0.0)
    return jnp.sum(picked, axis=1, keepdims=True) * jnp.float32(-1.0 / n)


def _smooth_l1_sigmoid_rows(x, t):
    # F.smooth_l1_loss(sigmoid(x), t), beta=1.0, mean reduction.
    d = jax.nn.sigmoid(x) - t
    ad = jnp.abs(d)
    per = jnp.where(ad < 1.0, 0.5 * d * d, ad - 0.5)
    return jnp.sum(per, axis=1, keepdims=True) * jnp.float32(1.0 / per.size)


_LOSS_ROW_FNS = {
    "binary_cls": _bce_with_logits_rows,
    "multi_cls": _nll_rows,
    "sigmoid_regression": _smooth_l1_sigmoid_rows,
}


# ---------------------------------------------------------------------------
# Fused kernel: one packed (B, W_total) f32 slab in VMEM, one SMEM f32
# vector of [per-property losses..., weighted total] out.
# ---------------------------------------------------------------------------

def _make_fused_kernel(specs):
    """specs: tuple of (ptype, (x_lo, x_hi), (t_lo, t_hi), weight)."""
    n_props = len(specs)

    def kernel(slab_ref, out_ref):
        slab = slab_ref[...]                       # (B, W) f32, one VMEM tile
        nrows = slab.shape[0]
        total_rows = jnp.zeros((nrows, 1), jnp.float32)
        for i, (ptype, (x0, x1), (t0, t1), w) in enumerate(specs):
            x = slab[:, x0:x1]                     # static lane slices: views
            t = slab[:, t0:t1]
            rows = _LOSS_ROW_FNS[ptype](x, t)      # (B, 1)
            out_ref[i] = jnp.sum(rows)             # per-property scalar loss
            total_rows = total_rows + rows * jnp.float32(w)
        out_ref[n_props] = jnp.sum(total_rows)     # weighted total, in-kernel

    return kernel


def make_fused_loss_fn(ptypes, weights):
    """Build a jitted fn mapping (logit, target) pairs -> (n_props+1,) f32
    device vector: [loss_0, ..., loss_{n-1}, weighted_total]."""
    ptypes = tuple(ptypes)
    weights = tuple(float(w) for w in weights)
    n_props = len(ptypes)

    @jax.jit
    def fn(*flat_inputs):
        # Pack everything into one lane-dense f32 slab; cast / reshape targets
        # here (inside the jit) so it fuses with the packing concat.
        cols = []
        specs = []
        off = 0
        for i, ptype in enumerate(ptypes):
            x = jnp.asarray(flat_inputs[2 * i]).astype(jnp.float32)
            x = x.reshape(x.shape[0], -1)
            t = jnp.asarray(flat_inputs[2 * i + 1])
            if ptype == "multi_cls":
                # class indices as exact f32 values (class counts << 2^24)
                t = t.astype(jnp.float32).reshape(-1, 1)
            else:
                t = t.astype(jnp.float32).reshape(t.shape[0], -1)
            xw, tw = x.shape[-1], t.shape[-1]
            specs.append((ptype, (off, off + xw),
                          (off + xw, off + xw + tw), weights[i]))
            cols.append(x)
            cols.append(t)
            off += xw + tw

        slab = jnp.concatenate(cols, axis=-1)      # (B, W_total) f32
        kernel = _make_fused_kernel(tuple(specs))
        out = pl.pallas_call(
            kernel,
            out_shape=jax.ShapeDtypeStruct((n_props + 1,), jnp.float32),
            in_specs=[pl.BlockSpec(memory_space=pltpu.MemorySpace.VMEM)],
            out_specs=pl.BlockSpec(memory_space=pltpu.MemorySpace.SMEM),
        )(slab)
        return out

    return fn


# ---------------------------------------------------------------------------
# FaceAttrCriterion equivalent.
# ---------------------------------------------------------------------------

class FaceAttrCriterion:
    def __init__(self, config):
        self.properties = config.get("properties")
        self.weight_dict = config.get("losses_weights")
        if self.weight_dict is None:
            self.weight_dict = {}
        self._fn_cache = {}

    def _get_fused_fn(self, prop_specs):
        fn = self._fn_cache.get(prop_specs)
        if fn is None:
            fn = make_fused_loss_fn(
                tuple(p[1] for p in prop_specs),
                tuple(p[2] for p in prop_specs),
            )
            self._fn_cache[prop_specs] = fn
        return fn

    def __call__(self, res, target_dict):
        names = []
        prop_specs = []
        flat_inputs = []
        for prop, logit in res.items():
            ptype = self.properties.get(prop).get("type")
            if ptype not in _LOSS_ROW_FNS:
                raise NotImplementedError(
                    "Property type {} not supported".format(ptype))
            w = self.weight_dict.get(prop)
            if w is None:
                w = 1.0
            names.append(prop)
            prop_specs.append((prop, ptype, float(w)))
            flat_inputs.append(logit)
            flat_inputs.append(target_dict[prop])

        fn = self._get_fused_fn(tuple(prop_specs))
        out = fn(*flat_inputs)          # single fused kernel launch, (n+1,) f32

        # Non-blocking: start the host copy, but do NOT sync here. loss_dict
        # values are lazy 0-d device scalars; call float(v) only when logging.
        try:
            out.copy_to_host_async()
        except AttributeError:
            pass
        loss = out[len(names)]          # weighted total (computed in-kernel)
        loss_dict = {name: out[i] for i, name in enumerate(names)}
        return loss, loss_dict


# ---------------------------------------------------------------------------
# Pure-JAX reference (for a correctness sanity check in the demo).
# ---------------------------------------------------------------------------

def _reference(res, target_dict, config):
    props = config["properties"]
    wd = config.get("losses_weights") or {}
    out = {}
    for k, logit in res.items():
        pt = props[k]["type"]
        t = target_dict[k]
        if pt == "binary_cls":
            x = logit.astype(jnp.float32)
            tt = t.astype(jnp.float32)
            out[k] = jnp.mean(jnp.maximum(x, 0.0) - x * tt
                              + jnp.log1p(jnp.exp(-jnp.abs(x))))
        elif pt == "multi_cls":
            lp = logit.astype(jnp.float32)
            out[k] = -jnp.mean(
                jnp.take_along_axis(lp, t.astype(jnp.int32)[:, None], axis=1))
        else:
            d = jax.nn.sigmoid(logit.astype(jnp.float32)) - t.astype(jnp.float32)
            ad = jnp.abs(d)
            out[k] = jnp.mean(jnp.where(ad < 1.0, 0.5 * d * d, ad - 0.5))
    total = 0.0
    for k, v in out.items():
        w = wd.get(k)
        if w is None:
            w = 1.0
        total = total + w * v
    return total, out


# ---------------------------------------------------------------------------
# Demo / smoke test.
# ---------------------------------------------------------------------------

if __name__ == "__main__":
    key = jax.random.PRNGKey(0)
    k1, k2, k3, k4, k5, k6 = jax.random.split(key, 6)

    B = 8           # batch
    K = 4           # multi-label width for binary_cls / regression targets
    C = 16          # number of classes for multi_cls

    config = {
        "properties": {
            "gender":    {"type": "binary_cls"},
            "age_group": {"type": "multi_cls"},
            "yaw":       {"type": "sigmoid_regression"},
        },
        "losses_weights": {
            "gender": 1.0,
            "age_group": 0.5,
            # "yaw" intentionally missing -> defaults to 1.0
        },
    }

    # Model outputs ("res"): logits per property.
    gender_logit = jax.random.normal(k1, (B, K), dtype=jnp.float32)
    # nll_loss expects log-probabilities (log_softmax applied upstream).
    age_raw = jax.random.normal(k2, (B, C), dtype=jnp.float32)
    age_logprob = jax.nn.log_softmax(age_raw, axis=-1)
    yaw_logit = jax.random.normal(k3, (B, K), dtype=jnp.float32)

    res = {
        "gender": gender_logit,
        "age_group": age_logprob,
        "yaw": yaw_logit,
    }

    # Targets.
    gender_target = jax.random.bernoulli(k4, 0.5, (B, K)).astype(jnp.float32)
    age_target = jax.random.randint(k5, (B,), 0, C, dtype=jnp.int32)
    yaw_target = jax.random.uniform(k6, (B, K), dtype=jnp.float32)

    target_dict = {
        "gender": gender_target,
        "age_group": age_target,
        "yaw": yaw_target,
    }

    criterion = FaceAttrCriterion(config)
    loss, loss_dict = criterion(res, target_dict)
    loss = jax.block_until_ready(loss)

    # Sanity check against a pure-JAX reference (float() here counts as a
    # "logging step"; the per-call path above never blocks on host sync).
    ref_total, ref_dict = _reference(res, target_dict, config)
    assert abs(float(loss) - float(ref_total)) < 1e-3, (float(loss),
                                                        float(ref_total))
    for name in res:
        assert abs(float(loss_dict[name]) - float(ref_dict[name])) < 1e-3, name

    print("KERNEL_OK")
</pallas_src>

<mosaic_0001>
module attributes {stable_mosaic.version = 11 : i64} {
  func.func @kernel(%arg0: memref<8x33xf32, #tpu.memory_space<vmem>>, %arg1: memref<4xf32, #tpu.memory_space<smem>>) attributes {dimension_semantics = [], scalar_prefetch = 0 : i64, scratch_operands = 0 : i64, tpu.core_type = #tpu.core_type<tc>} {
    %c0 = arith.constant 0 : index
    %c0_0 = arith.constant 0 : index
    %0 = vector.load %arg0[%c0, %c0_0] : memref<8x33xf32, #tpu.memory_space<vmem>>, vector<8x33xf32>
    %cst = arith.constant 0.000000e+00 : f32
    %1 = vector.broadcast %cst : f32 to vector<8x1xf32>
    %2 = vector.extract_strided_slice %0 {offsets = [0, 0], sizes = [8, 4], strides = [1, 1]} : vector<8x33xf32> to vector<8x4xf32>
    %3 = vector.extract_strided_slice %0 {offsets = [0, 4], sizes = [8, 4], strides = [1, 1]} : vector<8x33xf32> to vector<8x4xf32>
    %cst_1 = arith.constant 0.000000e+00 : f32
    %4 = vector.broadcast %cst_1 : f32 to vector<8x4xf32>
    %5 = arith.maximumf %2, %4 : vector<8x4xf32>
    %6 = arith.mulf %2, %3 : vector<8x4xf32>
    %7 = arith.subf %5, %6 : vector<8x4xf32>
    %8 = math.absf %2 : vector<8x4xf32>
    %cst_2 = arith.constant 0.000000e+00 : f32
    %9 = vector.broadcast %cst_2 : f32 to vector<8x4xf32>
    %10 = arith.subf %9, %8 : vector<8x4xf32>
    %11 = math.exp %10 : vector<8x4xf32>
    %12 = math.log1p %11 : vector<8x4xf32>
    %13 = arith.addf %7, %12 : vector<8x4xf32>
    %cst_3 = arith.constant dense<0.000000e+00> : vector<8xf32>
    %14 = vector.multi_reduction <add>, %13, %cst_3 [1] : vector<8x4xf32> to vector<8xf32>
    %15 = vector.shape_cast %14 : vector<8xf32> to vector<8x1xf32>
    %cst_4 = arith.constant 3.125000e-02 : f32
    %16 = vector.broadcast %cst_4 : f32 to vector<8x1xf32>
    %17 = arith.mulf %15, %16 : vector<8x1xf32>
    %18 = vector.shape_cast %17 : vector<8x1xf32> to vector<1x8x1xf32>
    %cst_5 = arith.constant dense<0.000000e+00> : vector<1xf32>
    %19 = vector.multi_reduction <add>, %18, %cst_5 [1, 2] : vector<1x8x1xf32> to vector<1xf32>
    %20 = vector.shape_cast %19 : vector<1xf32> to vector<1x1x1xf32>
    %21 = vector.extract %20[0, 0, 0] : f32 from vector<1x1x1xf32>
    %c0_6 = arith.constant 0 : index
    %22 = memref.load %arg1[%c0_6] : memref<4xf32, #tpu.memory_space<smem>>
    memref.store %21, %arg1[%c0_6] : memref<4xf32, #tpu.memory_space<smem>>
    %cst_7 = arith.constant 1.000000e+00 : f32
    %23 = vector.broadcast %cst_7 : f32 to vector<8x1xf32>
    %24 = arith.mulf %17, %23 : vector<8x1xf32>
    %25 = arith.addf %1, %24 : vector<8x1xf32>
    %26 = vector.extract_strided_slice %0 {offsets = [0, 8], sizes = [8, 16], strides = [1, 1]} : vector<8x33xf32> to vector<8x16xf32>
    %27 = vector.extract_strided_slice %0 {offsets = [0, 24], sizes = [8, 1], strides = [1, 1]} : vector<8x33xf32> to vector<8x1xf32>
    %28 = tpu.iota {dimensions = array<i32: 1>} : vector<8x16xi32>
    %29 = arith.sitofp %28 : vector<8x16xi32> to vector<8x16xf32>
    %30 = vector.broadcast %27 : vector<8x1xf32> to vector<8x16xf32>
    %31 = arith.cmpf oeq, %29, %30 : vector<8x16xf32>
    %cst_8 = arith.constant 0.000000e+00 : f32
    %32 = vector.broadcast %cst_8 : f32 to vector<8x16xf32>
    %33 = arith.select %31, %26, %32 : vector<8x16xi1>, vector<8x16xf32>
    %cst_9 = arith.constant dense<0.000000e+00> : vector<8xf32>
    %34 = vector.multi_reduction <add>, %33, %cst_9 [1] : vector<8x16xf32> to vector<8xf32>
    %35 = vector.shape_cast %34 : vector<8xf32> to vector<8x1xf32>
    %cst_10 = arith.constant -1.250000e-01 : f32
    %36 = vector.broadcast %cst_10 : f32 to vector<8x1xf32>
    %37 = arith.mulf %35, %36 : vector<8x1xf32>
    %38 = vector.shape_cast %37 : vector<8x1xf32> to vector<1x8x1xf32>
    %cst_11 = arith.constant dense<0.000000e+00> : vector<1xf32>
    %39 = vector.multi_reduction <add>, %38, %cst_11 [1, 2] : vector<1x8x1xf32> to vector<1xf32>
    %40 = vector.shape_cast %39 : vector<1xf32> to vector<1x1x1xf32>
    %41 = vector.extract %40[0, 0, 0] : f32 from vector<1x1x1xf32>
    %c1 = arith.constant 1 : index
    %42 = memref.load %arg1[%c1] : memref<4xf32, #tpu.memory_space<smem>>
    memref.store %41, %arg1[%c1] : memref<4xf32, #tpu.memory_space<smem>>
    %cst_12 = arith.constant 5.000000e-01 : f32
    %43 = vector.broadcast %cst_12 : f32 to vector<8x1xf32>
    %44 = arith.mulf %37, %43 : vector<8x1xf32>
    %45 = arith.addf %25, %44 : vector<8x1xf32>
    %46 = vector.extract_strided_slice %0 {offsets = [0, 25], sizes = [8, 4], strides = [1, 1]} : vector<8x33xf32> to vector<8x4xf32>
    %47 = vector.extract_strided_slice %0 {offsets = [0, 29], sizes = [8, 4], strides = [1, 1]} : vector<8x33xf32> to vector<8x4xf32>
    %48 = arith.negf %46 : vector<8x4xf32>
    %49 = math.exp %48 : vector<8x4xf32>
    %cst_13 = arith.constant 1.000000e+00 : f32
    %50 = vector.broadcast %cst_13 : f32 to vector<8x4xf32>
    %51 = arith.addf %50, %49 : vector<8x4xf32>
    %52 = arith.divf %50, %51 : vector<8x4xf32>
    %53 = arith.subf %52, %47 : vector<8x4xf32>
    %54 = math.absf %53 : vector<8x4xf32>
    %cst_14 = arith.constant 1.000000e+00 : f32
    %55 = vector.broadcast %cst_14 : f32 to vector<8x4xf32>
    %56 = arith.cmpf olt, %54, %55 : vector<8x4xf32>
    %cst_15 = arith.constant 5.000000e-01 : f32
    %57 = vector.broadcast %cst_15 : f32 to vector<8x4xf32>
    %58 = arith.mulf %57, %53 : vector<8x4xf32>
    %59 = arith.mulf %58, %53 : vector<8x4xf32>
    %cst_16 = arith.constant 5.000000e-01 : f32
    %60 = vector.broadcast %cst_16 : f32 to vector<8x4xf32>
    %61 = arith.subf %54, %60 : vector<8x4xf32>
    %62 = arith.select %56, %59, %61 : vector<8x4xi1>, vector<8x4xf32>
    %cst_17 = arith.constant dense<0.000000e+00> : vector<8xf32>
    %63 = vector.multi_reduction <add>, %62, %cst_17 [1] : vector<8x4xf32> to vector<8xf32>
    %64 = vector.shape_cast %63 : vector<8xf32> to vector<8x1xf32>
    %cst_18 = arith.constant 3.125000e-02 : f32
    %65 = vector.broadcast %cst_18 : f32 to vector<8x1xf32>
    %66 = arith.mulf %64, %65 : vector<8x1xf32>
    %67 = vector.shape_cast %66 : vector<8x1xf32> to vector<1x8x1xf32>
    %cst_19 = arith.constant dense<0.000000e+00> : vector<1xf32>
    %68 = vector.multi_reduction <add>, %67, %cst_19 [1, 2] : vector<1x8x1xf32> to vector<1xf32>
    %69 = vector.shape_cast %68 : vector<1xf32> to vector<1x1x1xf32>
    %70 = vector.extract %69[0, 0, 0] : f32 from vector<1x1x1xf32>
    %c2 = arith.constant 2 : index
    %71 = memref.load %arg1[%c2] : memref<4xf32, #tpu.memory_space<smem>>
    memref.store %70, %arg1[%c2] : memref<4xf32, #tpu.memory_space<smem>>
    %cst_20 = arith.constant 1.000000e+00 : f32
    %72 = vector.broadcast %cst_20 : f32 to vector<8x1xf32>
    %73 = arith.mulf %66, %72 : vector<8x1xf32>
    %74 = arith.addf %45, %73 : vector<8x1xf32>
    %75 = vector.shape_cast %74 : vector<8x1xf32> to vector<1x8x1xf32>
    %cst_21 = arith.constant dense<0.000000e+00> : vector<1xf32>
    %76 = vector.multi_reduction <add>, %75, %cst_21 [1, 2] : vector<1x8x1xf32> to vector<1xf32>
    %77 = vector.shape_cast %76 : vector<1xf32> to vector<1x1x1xf32>
    %78 = vector.extract %77[0, 0, 0] : f32 from vector<1x1x1xf32>
    %c3 = arith.constant 3 : index
    %79 = memref.load %arg1[%c3] : memref<4xf32, #tpu.memory_space<smem>>
    memref.store %78, %arg1[%c3] : memref<4xf32, #tpu.memory_space<smem>>
    return
  }
}

</mosaic_0001>

<bundles_post_ra>
// kernel: fn.1
= control target key start
LH: loop header
LB: loop body
LE: loop exit
PB: predicated region body
PF: predicated region fallthrough
CT: control target
= control target key end

     0   :  { %s174_s8 = smov 124   ;;  %s175_s9 = smov 120   ;;  %v176_v1 = vmov 24   ;;  %s197_s0 = inlined_call_operand.vmem [shape: f32[8,33], index: 0, kind: input, shape index: {}]   ;;  %s198_s1 = inlined_call_operand.hbm [shape: f32[4], index: 1, kind: output, shape index: {}]  }
   0x1   :  { %v9_v0 = vld [vmem:[%s197_s0] sm:$0xff]  ;;  %155 = vset.pattern.permute.xlu0 %v176_v1 }
   0x2   :  { %12 = vrot.lane.b32.xlu0 %v9_v0, %s174_s8  ;;  %58 = vrot.lane.b32.xlu1 %v9_v0, %s175_s9 }
   0x3   :  { %6 = vsyncpa [#allocation3], 0  ;;  %v17_v2 = vand.u32 2147483647, %v9_v0  ;;  %v140_v5 = vmul.f32 -1.442695, %v9_v0  ;;  %v50_v30 = vlaneseq }
   0x4   :  { %v10_v17 = vmax.f32 %v9_v0, 0.0  ;;  %vm31_vm1 = vcmask 31744   ;;  %s177_s0 = smov 103   ;;  %vm62_vm4 = vcmask 130048   ;;  %vm36_vm5 = vcmask 7168   ;;  %s178_s14 = smov [#allocation2]  }
   0x5   :  { %v18_v3 = vsub.f32 0.0, %v17_v2  ;;  %v51_v31 = vand.u32 127, %v50_v30 }
   0x6   :  { %54 = vperm.xlu0 %155, %v9_v0  }
   0x7   :  { %v19_v4 = vmul.f32 1.442695, %v18_v3  ;;  %v52_v32 = vcvt.s32.f32 %v51_v31 }
   0x9   :  { %156 = vpow2.f32 %v19_v4 }
   0xa   :  { %158 = vpow2.f32 %v140_v5 }
  0x16   :  { %v157_v6 = vpop.eup %156 }
  0x17   :  { %v159_v7 = vpop.eup %158  ;;  %v21_v8 = vadd.f32 1.0, %v157_v6  ;;  %v24_v10 = vmul.f32 -0.5, %v157_v6  ;;  %v27_v13 = vand.u32 2147483647, %v157_v6 }
  0x18   :  { %v84_v9 = vadd.f32 1.0, %v159_v7 }
  0x19   :  { %160 = vlog2.f32 %v21_v8  ;;  %v25_v11 = vadd.f32 1.0, %v24_v10  ;;  %vm28_vm0 = vcmp.lt.f32.partialorder %v27_v13, 0.0004427343 }
  0x1a   :  { %162 = vrcp.f32 %v84_v9 }
  0x1b   :  { %v26_v16 = vmul.f32 %v157_v6, %v25_v11 }
  0x26   :  { %v161_v12 = vpop.eup %160 }
  0x27   :  { %v163_v14 = vpop.eup %162  ;;  %v23_v15 = vmul.f32 0.6931472, %v161_v12 }
  0x29   :  { %v29_v21 = vsel %vm28_vm0, %v26_v16, %v23_v15 }
  0x74   :  { %v13_v18 = vpop.permute.xlu0 %12  ;;  %v59_v34 = vpop.permute.xlu1 %58 }
  0x75   :  { %v15_v19 = vmul.f32 %v13_v18, %v9_v0  ;;  %v87_v20 = vsub.f32 %v163_v14, %v13_v18 }
  0x77   :  { %v16_v22 = vsub.f32 %v10_v17, %v15_v19  ;;  %v90_v23 = vmul.f32 0.5, %v87_v20  ;;  %v88_v24 = vand.u32 2147483647, %v87_v20 }
  0x79   :  { %vm89_vm2 = vcmp.lt.f32.partialorder %v88_v24, 1.0  ;;  %v91_v25 = vmul.f32 %v90_v23, %v87_v20  ;;  %v141_v26 = vadd.f32 -0.5, %v88_v24  ;;  %v30_v27 = vadd.f32 %v29_v21, %v16_v22 }
  0x7b   :  { %v93_v28 = vsel %vm89_vm2, %v91_v25, %v141_v26  ;;  %v32_v29 = vsel %vm31_vm1, %v30_v27, 0.0 }
  0x7c   :  { %95 = vrot.lane.b32.xlu1 %v93_v28, %s177_s0  ;;  %33 = vadd.xlane.f32.xlu0 %v32_v29 }
  0x81   :  { %v55_v33 = vpop.permute.xlu0 %54 }
  0x82   :  { %vm57_vm3 = vcmp.eq.f32.partialorder %v52_v32, %v55_v33 }
  0x83   :  { %v61_v35 = vsel %vm57_vm3, %v59_v34, 0.0 }
  0x84   :  { %v63_v36 = vsel %vm62_vm4, %v61_v35, 0.0 }
  0xa0   :  { %64 = vadd.xlane.f32.xlu1 %v63_v36 }
  0xee   :  { %v96_v37 = vpop.permute.xlu1 %95 }
  0xef   :  { %v98_v38 = vsel %vm31_vm1, %v96_v37, 0.0 }
  0xf0   :  { %99 = vadd.xlane.f32.xlu0 %v98_v38 }
 0x105   :  { %v34_v39 = vpop.xlane.xlu0 %33 }
 0x106   :  { %v35_v40 = vmul.f32 0.03125, %v34_v39 }
 0x108   :  { %v37_v41 = vsel %vm36_vm5, %v35_v40, 0.0 }
 0x109   :  { %38 = vadd.xlane.f32.xlu1 %v37_v41 }
 0x129   :  { %v65_v42 = vpop.xlane.xlu1 %64 }
 0x12a   :  { %v66_v43 = vmul.f32 -0.125, %v65_v42 }
 0x12c   :  { %v79_v44 = vmul.f32 0.5, %v66_v43  ;;  %v67_v45 = vsel %vm36_vm5, %v66_v43, 0.0 }
 0x12d   :  { %68 = vadd.xlane.f32.xlu0 %v67_v45 }
 0x12e   :  { %v80_v46 = vadd.f32 %v79_v44, %v35_v40 }
 0x179   :  { %v100_v47 = vpop.xlane.xlu0 %99 }
 0x17a   :  { %v101_v48 = vmul.f32 0.03125, %v100_v47 }
 0x17c   :  { %v102_v49 = vsel %vm36_vm5, %v101_v48, 0.0  ;;  %v114_v50 = vadd.f32 %v101_v48, %v80_v46 }
 0x17d   :  { %103 = vadd.xlane.f32.xlu1 %v102_v49 }
 0x17e   :  { %v115_v51 = vsel %vm36_vm5, %v114_v50, 0.0 }
 0x17f   :  { %116 = vadd.xlane.f32.xlu0 %v115_v51 }
 0x192   :  { %v39_v52 = vpop.xlane.xlu1 %38 }
 0x193   :  { %v40_v53 = vrot.slane %v39_v52, 4 }
 0x195   :  { %v41_v54 = vadd.f32 %v40_v53, %v39_v52 }
 0x197   :  { %v42_v55 = vrot.slane %v41_v54, 2 }
 0x199   :  { %v43_v56 = vadd.f32 %v42_v55, %v41_v54 }
 0x19b   :  { %v44_v57 = vrot.slane %v43_v56, 1 }
 0x19d   :  { %v45_v58 = vadd.f32 %v44_v57, %v43_v56 }
 0x19f   :  { %142 = vpush %v45_v58 }
 0x1b6   :  { %v69_v59 = vpop.xlane.xlu0 %68 }
 0x1b7   :  { %v70_v60 = vrot.slane %v69_v59, 4 }
 0x1b9   :  { %v71_v61 = vadd.f32 %v70_v60, %v69_v59 }
 0x1bb   :  { %v72_v62 = vrot.slane %v71_v61, 2 }
 0x1bd   :  { %v73_v63 = vadd.f32 %v72_v62, %v71_v61 }
 0x1bf   :  { %v74_v0 = vrot.slane %v73_v63, 1 }
 0x1c1   :  { %v75_v1 = vadd.f32 %v74_v0, %v73_v63 }
 0x1c3   :  { %144 = vpush %v75_v1 }
 0x1d0   :  { %s143_s10 = spop %142 }
 0x1d1   :  { %48 = sst [smem:[#allocation2]] %s143_s10 }
 0x1f4   :  { %s145_s11 = spop %144 }
 0x1f5   :  { %78 = sst [smem:[#allocation2 + $0x1]] %s145_s11 }
 0x206   :  { %v104_v2 = vpop.xlane.xlu1 %103 }
 0x207   :  { %v105_v3 = vrot.slane %v104_v2, 4 }
 0x208   :  { %v117_v4 = vpop.xlane.xlu0 %116 }
 0x209   :  { %v106_v5 = vadd.f32 %v105_v3, %v104_v2  ;;  %v118_v6 = vrot.slane %v117_v4, 4 }
 0x20b   :  { %v107_v7 = vrot.slane %v106_v5, 2  ;;  %v119_v8 = vadd.f32 %v118_v6, %v117_v4 }
 0x20d   :  { %v108_v9 = vadd.f32 %v107_v7, %v106_v5  ;;  %v120_v10 = vrot.slane %v119_v8, 2 }
 0x20f   :  { %v121_v11 = vadd.f32 %v120_v10, %v119_v8  ;;  %v109_v12 = vrot.slane %v108_v9, 1 }
 0x211   :  { %v110_v13 = vadd.f32 %v109_v12, %v108_v9  ;;  %v122_v14 = vrot.slane %v121_v11, 1 }
 0x213   :  { %146 = vpush %v110_v13  ;;  %v123_v15 = vadd.f32 %v122_v14, %v121_v11 }
 0x215   :  { %148 = vpush %v123_v15 }
 0x244   :  { %s147_s12 = spop %146 }
 0x245   :  { %113 = sst [smem:[#allocation2 + $0x2]] %s147_s12 }
 0x246   :  { %s149_s13 = spop %148 }
 0x247   :  { %126 = sst [smem:[#allocation2 + $0x3]] %s149_s13 }
 0x248   :  { %134 = dma.smem_to_hbm %s178_s14, 16, %s198_s1, [#allocation3]  }
 0x249   :  { %172 = dma.done.wait [#allocation3], 16  }
 0x24a   :  { %173 = vsyncadd [#allocation3], 4294967280 }
 0x24b   :  { %138 = sfence }
 0x24c   :  { %139 = vsyncpa [#allocation3], 1 }

</bundles_post_ra>
